<compile_context>
chip_gen: v5e
topology: v5e:2x2
jax: 0.10.0
libtpu: 0.0.40
codegen_flags: <defaults>
</compile_context>

<pallas_src>
import jax
import jax.numpy as jnp
from jax.experimental import pallas as pl
from jax.experimental.pallas import tpu as pltpu


def _mfm_kernel(x_ref, o_ref):
    # x_ref tile: (tn, 2, ta, B) holding both channel halves of tn samples;
    # o_ref tile: (tn, ta, B).  Read each half directly from the ref (no
    # materialized 4-D intermediate) and max in the native dtype.
    o_ref[...] = jnp.maximum(x_ref[:, 0, :, :], x_ref[:, 1, :, :])


def _vmem_capacity_bytes():
    """Per-TensorCore VMEM capacity; conservative (v7x) default on failure."""
    try:
        info = pltpu.get_tpu_info()
        cap = getattr(info, "vmem_capacity_bytes", None)
        if cap:
            return int(cap)
    except Exception:
        pass
    return 64 * 1024 * 1024


def _largest_divisor_le(n, limit, multiple_of=1):
    """Largest divisor d of n with d <= limit and d % multiple_of == 0, or None."""
    best = None
    d = 1
    while d * d <= n:
        if n % d == 0:
            for c in (d, n // d):
                if c <= limit and c % multiple_of == 0 and (best is None or c > best):
                    best = c
        d += 1
    return best


def _choose_half_layout(M, sub, max_B):
    """Factor M == A*B so the lane (last) dim B is as vreg-dense as possible.

    Fast path: B == 128 when 128 | M (100% lane utilization).  Otherwise pick
    the divisor B of M (B <= max_B, so a minimal block still fits VMEM) that
    maximizes lane utilization B/(128*ceil(B/128)) times sublane utilization
    min(A, sub)/sub.  Ties prefer larger B.
    """
    if M % 128 == 0:
        return M // 128, 128
    best, best_score = (M, 1), -1.0
    d = 1
    while d * d <= M:
        if M % d == 0:
            for B in (d, M // d):
                if B > max_B:
                    continue
                A = M // B
                lane_util = B / (128.0 * ((B + 127) // 128))
                sub_util = min(A, sub) / float(sub)
                score = lane_util * sub_util
                if score > best_score or (score == best_score and B > best[1]):
                    best_score, best = score, (A, B)
        d += 1
    return best


def mfm(x, dim=1):
    """Max Feature Map over `dim` (must be the channel axis of NCHW input)."""
    assert dim == 1, "This kernel implements the NCHW channel-split MFM (dim=1)."
    N, C, H, W = x.shape
    assert C % 2 == 0, "MFM requires an even number of channels."
    C2 = C // 2
    M = C2 * H * W  # elements per half per sample

    itemsize = jnp.dtype(x.dtype).itemsize
    # Sublane packing granularity: 8 (f32) / 16 (bf16) / 32 (8-bit dtypes).
    sub = 8 * max(1, 4 // itemsize)

    # ---- generation-aware block / VMEM budget ------------------------------
    vmem_cap = _vmem_capacity_bytes()
    if vmem_cap >= 96 * 1024 * 1024:
        # v5e / v6e: 128 MiB physical VMEM -> larger blocks, 64 MiB scoped limit.
        target_block_bytes = 12 * 1024 * 1024
        vmem_limit = 64 * 1024 * 1024
    else:
        # v7x: 64 MiB per TensorCore -> cap input blocks at 8 MiB, limit 48 MiB.
        target_block_bytes = 8 * 1024 * 1024
        vmem_limit = 48 * 1024 * 1024

    # ---- lane-dense (A, B) view of each half (free reshape for NCHW) -------
    max_B = max(128, target_block_bytes // (2 * sub * itemsize))
    A, B = _choose_half_layout(M, sub, max_B)
    x4 = x.reshape(N, 2, A, B)

    # ---- tile selection -----------------------------------------------------
    row_bytes = 2 * B * itemsize  # one A-row, both halves
    target_rows = max(1, target_block_bytes // row_bytes)

    if A <= target_rows:
        # Whole sample fits a block: take it whole and merge samples per block.
        ta = A
        sample_bytes = A * row_bytes
        tn_target = max(1, target_block_bytes // sample_bytes)
        tn = _largest_divisor_le(N, tn_target) or 1
        if N > tn and 2 * tn <= tn_target:
            # Best divisor is far below target: accept one masked tail batch
            # block in exchange for multi-MiB DMAs.
            tn = min(N, tn_target)
    else:
        # Tile rows.  Prefer a divisor of A (no masked tail), multiple of sub.
        tn = 1
        ta = _largest_divisor_le(A, target_rows, multiple_of=sub)
        if ta is None:
            ta = min(max(sub, (target_rows // sub) * sub),
                     ((A + sub - 1) // sub) * sub)

    grid_n = pl.cdiv(N, tn)
    grid_r = pl.cdiv(A, ta)
    total_in_bytes = N * 2 * M * itemsize

    # Guarantee >= 2 programs on a parallel axis when there is real work:
    # keeps both v7x TensorCores busy and overlaps input/output DMAs.
    if grid_n * grid_r == 1 and total_in_bytes > (4 << 20):
        if N >= 2:
            tn = _largest_divisor_le(N, max(1, N // 2)) or max(1, N // 2)
        else:
            half = _largest_divisor_le(A, max(1, A // 2), multiple_of=sub)
            if half is None and A >= 2 * sub:
                half = ((A // 2 + sub - 1) // sub) * sub  # masked tail allowed
            if half:
                ta = half
        grid_n = pl.cdiv(N, tn)
        grid_r = pl.cdiv(A, ta)

    in_spec = pl.BlockSpec((tn, 2, ta, B), lambda n, r: (n, 0, r, 0))
    out_spec = pl.BlockSpec((tn, ta, B), lambda n, r: (n, r, 0))

    cost = pl.CostEstimate(
        flops=N * M,                          # one max per output element
        transcendentals=0,
        bytes_accessed=3 * N * M * itemsize,  # read both halves + write result
    )

    out_flat = pl.pallas_call(
        _mfm_kernel,
        out_shape=jax.ShapeDtypeStruct((N, A, B), x.dtype),
        grid_spec=pltpu.PrefetchScalarGridSpec(
            num_scalar_prefetch=0,
            grid=(grid_n, grid_r),
            in_specs=[in_spec],
            out_specs=out_spec,
        ),
        compiler_params=pltpu.CompilerParams(
            dimension_semantics=("parallel", "parallel"),
            vmem_limit_bytes=vmem_limit,
        ),
        cost_estimate=cost,
    )(x4)

    return out_flat.reshape(N, C2, H, W)


def mfm_ref(x, dim=1):
    low, up = jnp.split(x, 2, axis=dim)
    return jnp.maximum(low, up)


if __name__ == "__main__":
    key = jax.random.PRNGKey(0)

    # Main (lane-aligned) path: C/2*H*W is a multiple of 128.
    N, C, H, W = 2, 4, 16, 16
    x = jax.random.normal(key, (N, C, H, W), dtype=jnp.float32)
    out = jax.block_until_ready(mfm(x, dim=1))
    expected = mfm_ref(x, dim=1)
    assert out.shape == (N, C // 2, H, W), out.shape
    assert jnp.allclose(out, expected), "Pallas MFM mismatch vs reference (aligned path)"

    # Fallback (non-128-aligned) path: C/2*H*W = 3*7*7 = 147.
    key2 = jax.random.PRNGKey(0)
    N2, C2_, H2, W2 = 2, 6, 7, 7
    x2 = jax.random.normal(key2, (N2, C2_, H2, W2), dtype=jnp.float32)
    out2 = jax.block_until_ready(mfm(x2, dim=1))
    expected2 = mfm_ref(x2, dim=1)
    assert out2.shape == (N2, C2_ // 2, H2, W2), out2.shape
    assert jnp.allclose(out2, expected2), "Pallas MFM mismatch vs reference (fallback path)"

    print("KERNEL_OK")
</pallas_src>

<mosaic_0001>
module attributes {stable_mosaic.version = 11 : i64} {
  func.func @_mfm_kernel(%arg0: i32, %arg1: i32, %arg2: memref<2x2x4x128xf32, #tpu.memory_space<vmem>>, %arg3: memref<2x4x128xf32, #tpu.memory_space<vmem>>) attributes {dimension_semantics = [#tpu.dimension_semantics<parallel>, #tpu.dimension_semantics<parallel>], iteration_bounds = array<i64: 1, 1>, scalar_prefetch = 0 : i64, scratch_operands = 0 : i64, tpu.core_type = #tpu.core_type<tc>, window_params = [{transform_indices = @transform_0, window_bounds = array<i64: 2, 2, 4, 128>}, {transform_indices = @transform_1, window_bounds = array<i64: 2, 4, 128>}]} {
    %c0 = arith.constant 0 : index
    %c0_0 = arith.constant 0 : index
    %c0_1 = arith.constant 0 : index
    %c0_2 = arith.constant 0 : index
    %0 = vector.load %arg2[%c0, %c0_0, %c0_1, %c0_2] : memref<2x2x4x128xf32, #tpu.memory_space<vmem>>, vector<2x1x4x128xf32>
    %1 = vector.shape_cast %0 : vector<2x1x4x128xf32> to vector<2x4x128xf32>
    %c0_3 = arith.constant 0 : index
    %c1 = arith.constant 1 : index
    %c0_4 = arith.constant 0 : index
    %c0_5 = arith.constant 0 : index
    %2 = vector.load %arg2[%c0_3, %c1, %c0_4, %c0_5] : memref<2x2x4x128xf32, #tpu.memory_space<vmem>>, vector<2x1x4x128xf32>
    %3 = vector.shape_cast %2 : vector<2x1x4x128xf32> to vector<2x4x128xf32>
    %4 = arith.maximumf %1, %3 : vector<2x4x128xf32>
    %c0_6 = arith.constant 0 : index
    %c0_7 = arith.constant 0 : index
    %c0_8 = arith.constant 0 : index
    %5 = vector.load %arg3[%c0_6, %c0_7, %c0_8] : memref<2x4x128xf32, #tpu.memory_space<vmem>>, vector<2x4x128xf32>
    tpu.vector_store %arg3[%c0_6, %c0_7, %c0_8], %4 {strides = array<i32>} : memref<2x4x128xf32, #tpu.memory_space<vmem>>, vector<2x4x128xf32>,
    return
  }
  func.func @transform_0(%arg0: i32, %arg1: i32) -> (i32, i32, i32, i32) {
    %c0_i32 = arith.constant 0 : i32
    %c0_i32_0 = arith.constant 0 : i32
    %c0_i32_1 = arith.constant 0 : i32
    return %arg0, %c0_i32, %arg1, %c0_i32_0 : i32, i32, i32, i32
  }
  func.func @transform_1(%arg0: i32, %arg1: i32) -> (i32, i32, i32) {
    %c0_i32 = arith.constant 0 : i32
    %c0_i32_0 = arith.constant 0 : i32
    return %arg0, %arg1, %c0_i32 : i32, i32, i32
  }
}

</mosaic_0001>

<bundles_post_ra>
// kernel: tpu_custom_call.1
= control target key start
LH: loop header
LB: loop body
LE: loop exit
PB: predicated region body
PF: predicated region fallthrough
CT: control target
= control target key end

     0   :  { %6 = vsyncpa [#allocation3], 0  ;;  %s129_s0 = inlined_call_operand.hbm [shape: f32[2,2,4,128], index: 0, kind: input, shape index: {}]   ;;  %s130_s1 = inlined_call_operand.hbm [shape: f32[2,4,128], index: 1, kind: output, shape index: {}]  }
   0x1   :  { %7 = vsyncpa [#allocation4], 0  ;;  %s12_s8 = sshll.u32 %s129_s0, 4  ;;  %s109_s9 = smov [#allocation2]   ;;  %s13_s8 = int_to_ptr.hbm [resolvable:$true] %s12_s8 }
   0x2   :  { %s14_s10 = sshll.u32 %s109_s9, 4  ;;  %s110_s11 = smov 64   ;;  %s15_s10 = int_to_ptr.vmem [resolvable:$true] %s14_s10 }
   0x3   :  { %s111_s12 = smov 4  }
   0x4   :  { %20 = dma.hbm_to_vmem [thread:$0]  %s13_s8, 256, %s15_s10, [#allocation3], %s110_s11, %s110_s11, %s111_s12  }
   0x5   :  { %105 = dma.done.wait [#allocation3], 256  }
   0x6   :  { %106 = vsyncadd [#allocation3], 4294967040  ;;  %s112_s13 = smov [#allocation5]   ;;  %s40_s17 = sshll.u32 %s130_s1, 4  ;;  %v25_v0 = vld [vmem:[#allocation2] sm:$0xf]  ;;  %s41_s17 = int_to_ptr.hbm [resolvable:$true] %s40_s17 }
   0x7   :  { %s38_s14 = sshll.u32 %s112_s13, 4  ;;  %v28_v1 = vld [vmem:[#allocation2 + $0x4] sm:$0xf]  ;;  %v26_v2 = vld [vmem:[#allocation2 + $0x8] sm:$0xf]  ;;  %s39_s14 = int_to_ptr.vmem [resolvable:$true] %s38_s14 }
   0x8   :  { %v30_v3 = vmax.f32 %v25_v0, %v28_v1  ;;  %v29_v4 = vld [vmem:[#allocation2 + $0xc] sm:$0xf] }
   0x9   :  { %v31_v5 = vmax.f32 %v26_v2, %v29_v4 }
   0xa   :  { %32 = vst [vmem:[#allocation5] sm:$0xf] %v30_v3 }
   0xb   :  { %33 = vst [vmem:[#allocation5 + $0x4] sm:$0xf] %v31_v5 }
   0xc   :  { %46 = dma.vmem_to_hbm [thread:$0]  %s39_s14, 128, %s41_s17, [#allocation4], %s110_s11, %s110_s11, %s111_s12  }
   0xd   :  { %107 = dma.done.wait [#allocation4], 128  }
   0xe   :  { %108 = vsyncadd [#allocation4], 4294967168 }
   0xf   :  { %51 = vsyncpa [#allocation3], 1 }
  0x10   :  { %52 = vsyncpa [#allocation4], 1 }

</bundles_post_ra>
